<compile_context>
chip_gen: v7x
topology: tpu7x:2x2x1
jax: 0.10.0
libtpu: 0.0.40
codegen_flags: <defaults>
</compile_context>

<pallas_src>
import jax
import jax.numpy as jnp
from jax import lax
from jax.experimental import pallas as pl
from jax.experimental.pallas import tpu as pltpu


def rnn_forward_kernel(x2_ref, h0_ref, wih_t_ref, whh_t_ref, wd_t_ref, bd_ref,
                       out_ref, state_ref):
    Bp = h0_ref.shape[1]
    H = whh_t_ref.shape[0]
    T = x2_ref.shape[0] // Bp

    # --- Prologue: hoisted input projection for ALL time steps, bias folded via the
    # constant-1 column.  One bf16 MXU call, f32 result, no in-kernel reshape.
    xw = jnp.dot(x2_ref[...], wih_t_ref[...],
                 preferred_element_type=jnp.float32)          # (T*Bp, H) f32

    whh_t = whh_t_ref[...]                                    # (H, H) f32, hoisted

    # --- Recurrence: h and the running sum live in vregs; static Python unroll so
    # every XW slice uses a static, sublane-aligned offset (single vreg select).
    h = h0_ref[0]                                             # (Bp, H) f32
    ysum = jnp.zeros_like(h)
    for t in range(T):                                        # T static, tiny
        xw_t = xw[t * Bp:(t + 1) * Bp, :]
        h = jnp.tanh(xw_t + jnp.dot(h, whh_t, preferred_element_type=jnp.float32))
        ysum = ysum + h

    # --- Epilogue: mean over time, dropout (identity in eval), dense layer.
    # TODO(synk): training-mode stochastic dropout (pltpu.prng_*) not implemented.
    y_mean = ysum * (1.0 / T)
    logits = (
        jnp.dot(y_mean.astype(wd_t_ref.dtype), wd_t_ref[...],
                preferred_element_type=jnp.float32)
        + bd_ref[...]
    )
    out_ref[...] = logits.astype(out_ref.dtype)               # full (8, 128) lane-dense tile
    state_ref[0] = h.astype(state_ref.dtype)


def rnn_model_forward(x_onehot, h0, w_ih, w_hh, b_ih, b_hh, w_dense, b_dense):
    """x_onehot: (T, B, V) f32; h0: (1, B, H) f32.

    Returns (out (B, C), state (1, B, H)) matching RNNModel.forward (eval mode).
    """
    T, B, V = x_onehot.shape
    H = w_ih.shape[0]
    C = w_dense.shape[0]

    B_pad = ((B + 7) // 8) * 8
    C_pad = ((C + 127) // 128) * 128

    # --- Host-side layout plumbing (done once, outside the kernel):
    # pad batch, append the constant-1 bias column, merge (T, B_pad) -> one leading
    # dim (free view), cast the exact one-hot to bf16.
    x_p = jnp.pad(x_onehot, ((0, 0), (0, B_pad - B), (0, 0)))
    x_aug = jnp.concatenate([x_p, jnp.ones((T, B_pad, 1), x_p.dtype)], axis=-1)
    x2 = x_aug.reshape(T * B_pad, V + 1).astype(jnp.bfloat16)        # (T*Bp, V+1) bf16

    h0_p = jnp.pad(h0, ((0, 0), (0, B_pad - B), (0, 0)))             # (1, Bp, H) f32

    # W_ih^T with the folded RNN bias appended as an extra input row; bf16.
    wih_aug = jnp.concatenate(
        [w_ih.T, (b_ih + b_hh)[None, :]], axis=0).astype(jnp.bfloat16)  # (V+1, H)
    whh_t = w_hh.T                                                    # (H, H) f32 (recurrence)
    wd_t = jnp.pad(w_dense.T, ((0, 0), (0, C_pad - C))).astype(jnp.bfloat16)  # (H, C_pad)
    bd = jnp.pad(b_dense, (0, C_pad - C)).reshape(1, C_pad)           # (1, C_pad) f32

    grid_spec = pltpu.PrefetchScalarGridSpec(
        num_scalar_prefetch=0,
        grid=(1,),  # single invocation; recurrence fully unrolled inside the body
        in_specs=[
            pl.BlockSpec((T * B_pad, V + 1), lambda i: (0, 0)),   # X (+1 col), all steps
            pl.BlockSpec((1, B_pad, H), lambda i: (0, 0, 0)),     # h0
            pl.BlockSpec((V + 1, H), lambda i: (0, 0)),           # W_ih^T (+bias row)
            pl.BlockSpec((H, H), lambda i: (0, 0)),               # W_hh^T (f32)
            pl.BlockSpec((H, C_pad), lambda i: (0, 0)),           # W_dense^T (padded)
            pl.BlockSpec((1, C_pad), lambda i: (0, 0)),           # b_dense (padded)
        ],
        out_specs=[
            pl.BlockSpec((B_pad, C_pad), lambda i: (0, 0)),       # logits (padded)
            pl.BlockSpec((1, B_pad, H), lambda i: (0, 0, 0)),     # final state (padded)
        ],
    )

    flops = (2 * T * B_pad * (V + 1) * H
             + 2 * T * B_pad * H * H
             + 2 * B_pad * H * C_pad)
    transcendentals = T * B_pad * H
    bytes_accessed = (2 * T * B_pad * (V + 1)          # x2 (bf16)
                      + 4 * B_pad * H                  # h0
                      + 2 * (V + 1) * H                # W_ih^T (bf16)
                      + 4 * H * H                      # W_hh^T
                      + 2 * H * C_pad                  # W_dense^T (bf16)
                      + 4 * C_pad                      # b_dense
                      + 4 * B_pad * C_pad              # logits
                      + 4 * B_pad * H)                 # state

    out_p, state_p = pl.pallas_call(
        rnn_forward_kernel,
        grid_spec=grid_spec,
        out_shape=(
            jax.ShapeDtypeStruct((B_pad, C_pad), jnp.float32),
            jax.ShapeDtypeStruct((1, B_pad, H), jnp.float32),
        ),
        compiler_params=pltpu.CompilerParams(
            dimension_semantics=("arbitrary",),
        ),
        cost_estimate=pl.CostEstimate(
            flops=flops,
            transcendentals=transcendentals,
            bytes_accessed=bytes_accessed,
        ),
    )(x2, h0_p, wih_aug, whh_t, wd_t, bd)

    return out_p[:B, :C], state_p[:, :B, :]


def reference_forward(x_onehot, h0, w_ih, w_hh, b_ih, b_hh, w_dense, b_dense):
    """Pure-JAX f32 reference mirroring the PyTorch forward (eval mode)."""
    def step(h, x_t):
        h_new = jnp.tanh(x_t @ w_ih.T + b_ih + h @ w_hh.T + b_hh)
        return h_new, h_new

    h_final, ys = lax.scan(step, h0[0], x_onehot)
    y_mean = ys.mean(axis=0)
    out = y_mean @ w_dense.T + b_dense
    return out, h_final[None]


if __name__ == "__main__":
    # Small shapes consistent with the module: seq=8, batch=2, vocab=16,
    # hidden=32, n_class = vocab_size = 16 (single-layer unidirectional nn.RNN).
    T, B, V, H, C = 8, 2, 16, 32, 16

    key = jax.random.PRNGKey(0)
    k_tok, k_h0, k1, k2, k3, k4, k5, k6 = jax.random.split(key, 8)

    tokens = jax.random.randint(k_tok, (B, T), 0, V)                 # inputs: (batch, num_steps)
    # to_onehot + torch.stack -> time-major one-hot (T, B, V)
    x_onehot = jnp.transpose(jax.nn.one_hot(tokens, V, dtype=jnp.float32), (1, 0, 2))
    h0 = jax.random.normal(k_h0, (1, B, H), dtype=jnp.float32) * 0.1  # initial state

    # Deterministic parameter init (shapes follow nn.RNN / nn.Linear conventions).
    w_ih = jax.random.normal(k1, (H, V), dtype=jnp.float32) * 0.1
    w_hh = jax.random.normal(k2, (H, H), dtype=jnp.float32) * 0.1
    b_ih = jax.random.normal(k3, (H,), dtype=jnp.float32) * 0.1
    b_hh = jax.random.normal(k4, (H,), dtype=jnp.float32) * 0.1
    w_dense = jax.random.normal(k5, (C, H), dtype=jnp.float32) * 0.1
    b_dense = jax.random.normal(k6, (C,), dtype=jnp.float32) * 0.1

    out, state = rnn_model_forward(x_onehot, h0, w_ih, w_hh, b_ih, b_hh, w_dense, b_dense)
    out = jax.block_until_ready(out)
    state = jax.block_until_ready(state)

    ref_out, ref_state = reference_forward(
        x_onehot, h0, w_ih, w_hh, b_ih, b_hh, w_dense, b_dense)

    assert out.shape == (B, C) and state.shape == (1, B, H)
    # Tolerance accounts for the bf16 input projection / dense weights (per the
    # review); the recurrence itself (h, W_hh^T) and all accumulation are f32.
    assert jnp.allclose(out, ref_out, atol=2e-2, rtol=2e-2)
    assert jnp.allclose(state, ref_state, atol=2e-2, rtol=2e-2)

    print("KERNEL_OK")
</pallas_src>

<mosaic_0001>
module attributes {stable_mosaic.version = 11 : i64} {
  func.func @rnn_forward_kernel(%arg0: i32, %arg1: memref<64x17xbf16, #tpu.memory_space<vmem>>, %arg2: memref<1x8x32xf32, #tpu.memory_space<vmem>>, %arg3: memref<17x32xbf16, #tpu.memory_space<vmem>>, %arg4: memref<32x32xf32, #tpu.memory_space<vmem>>, %arg5: memref<32x128xbf16, #tpu.memory_space<vmem>>, %arg6: memref<1x128xf32, #tpu.memory_space<vmem>>, %arg7: memref<8x128xf32, #tpu.memory_space<vmem>>, %arg8: memref<1x8x32xf32, #tpu.memory_space<vmem>>) attributes {dimension_semantics = [#tpu.dimension_semantics<arbitrary>], iteration_bounds = array<i64: 1>, scalar_prefetch = 0 : i64, scratch_operands = 0 : i64, tpu.core_type = #tpu.core_type<tc>, window_params = [{pipeline_mode = #tpu.pipeline_mode<synchronous>, transform_indices = @transform_0, window_bounds = array<i64: 64, 17>}, {pipeline_mode = #tpu.pipeline_mode<synchronous>, transform_indices = @transform_1, window_bounds = array<i64: 1, 8, 32>}, {pipeline_mode = #tpu.pipeline_mode<synchronous>, transform_indices = @transform_2, window_bounds = array<i64: 17, 32>}, {pipeline_mode = #tpu.pipeline_mode<synchronous>, transform_indices = @transform_3, window_bounds = array<i64: 32, 32>}, {pipeline_mode = #tpu.pipeline_mode<synchronous>, transform_indices = @transform_4, window_bounds = array<i64: 32, 128>}, {pipeline_mode = #tpu.pipeline_mode<synchronous>, transform_indices = @transform_5, window_bounds = array<i64: 1, 128>}, {pipeline_mode = #tpu.pipeline_mode<synchronous>, transform_indices = @transform_6, window_bounds = array<i64: 8, 128>}, {pipeline_mode = #tpu.pipeline_mode<synchronous>, transform_indices = @transform_7, window_bounds = array<i64: 1, 8, 32>}]} {
    %c0 = arith.constant 0 : index
    %c0_0 = arith.constant 0 : index
    %0 = vector.load %arg1[%c0, %c0_0] : memref<64x17xbf16, #tpu.memory_space<vmem>>, vector<64x17xbf16>
    %c0_1 = arith.constant 0 : index
    %c0_2 = arith.constant 0 : index
    %1 = vector.load %arg3[%c0_1, %c0_2] : memref<17x32xbf16, #tpu.memory_space<vmem>>, vector<17x32xbf16>
    %cst = arith.constant dense<0.000000e+00> : vector<64x32xf32>
    %2 = tpu.matmul %0, %1, %cst {dimension_numbers = #tpu.dot_dimension_numbers<[1], [0], [0], [1], [0, 0, 1, 1], [], []>} : vector<64x17xbf16>, vector<17x32xbf16>, vector<64x32xf32> -> vector<64x32xf32>
    %c0_3 = arith.constant 0 : index
    %c0_4 = arith.constant 0 : index
    %3 = vector.load %arg4[%c0_3, %c0_4] : memref<32x32xf32, #tpu.memory_space<vmem>>, vector<32x32xf32>
    %c0_5 = arith.constant 0 : index
    %c0_6 = arith.constant 0 : index
    %c0_7 = arith.constant 0 : index
    %4 = vector.load %arg2[%c0_5, %c0_6, %c0_7] : memref<1x8x32xf32, #tpu.memory_space<vmem>>, vector<1x8x32xf32>
    %5 = vector.shape_cast %4 : vector<1x8x32xf32> to vector<8x32xf32>
    %cst_8 = arith.constant 0.000000e+00 : f32
    %6 = vector.broadcast %cst_8 : f32 to vector<8x32xf32>
    %7 = vector.extract_strided_slice %2 {offsets = [0, 0], sizes = [8, 32], strides = [1, 1]} : vector<64x32xf32> to vector<8x32xf32>
    %cst_9 = arith.constant dense<0.000000e+00> : vector<8x32xf32>
    %8 = tpu.matmul %5, %3, %cst_9 {dimension_numbers = #tpu.dot_dimension_numbers<[1], [0], [0], [1], [0, 0, 1, 1], [], []>} : vector<8x32xf32>, vector<32x32xf32>, vector<8x32xf32> -> vector<8x32xf32>
    %9 = arith.addf %7, %8 : vector<8x32xf32>
    %10 = math.tanh %9 : vector<8x32xf32>
    %11 = arith.addf %6, %10 : vector<8x32xf32>
    %12 = vector.extract_strided_slice %2 {offsets = [8, 0], sizes = [8, 32], strides = [1, 1]} : vector<64x32xf32> to vector<8x32xf32>
    %cst_10 = arith.constant dense<0.000000e+00> : vector<8x32xf32>
    %13 = tpu.matmul %10, %3, %cst_10 {dimension_numbers = #tpu.dot_dimension_numbers<[1], [0], [0], [1], [0, 0, 1, 1], [], []>} : vector<8x32xf32>, vector<32x32xf32>, vector<8x32xf32> -> vector<8x32xf32>
    %14 = arith.addf %12, %13 : vector<8x32xf32>
    %15 = math.tanh %14 : vector<8x32xf32>
    %16 = arith.addf %11, %15 : vector<8x32xf32>
    %17 = vector.extract_strided_slice %2 {offsets = [16, 0], sizes = [8, 32], strides = [1, 1]} : vector<64x32xf32> to vector<8x32xf32>
    %cst_11 = arith.constant dense<0.000000e+00> : vector<8x32xf32>
    %18 = tpu.matmul %15, %3, %cst_11 {dimension_numbers = #tpu.dot_dimension_numbers<[1], [0], [0], [1], [0, 0, 1, 1], [], []>} : vector<8x32xf32>, vector<32x32xf32>, vector<8x32xf32> -> vector<8x32xf32>
    %19 = arith.addf %17, %18 : vector<8x32xf32>
    %20 = math.tanh %19 : vector<8x32xf32>
    %21 = arith.addf %16, %20 : vector<8x32xf32>
    %22 = vector.extract_strided_slice %2 {offsets = [24, 0], sizes = [8, 32], strides = [1, 1]} : vector<64x32xf32> to vector<8x32xf32>
    %cst_12 = arith.constant dense<0.000000e+00> : vector<8x32xf32>
    %23 = tpu.matmul %20, %3, %cst_12 {dimension_numbers = #tpu.dot_dimension_numbers<[1], [0], [0], [1], [0, 0, 1, 1], [], []>} : vector<8x32xf32>, vector<32x32xf32>, vector<8x32xf32> -> vector<8x32xf32>
    %24 = arith.addf %22, %23 : vector<8x32xf32>
    %25 = math.tanh %24 : vector<8x32xf32>
    %26 = arith.addf %21, %25 : vector<8x32xf32>
    %27 = vector.extract_strided_slice %2 {offsets = [32, 0], sizes = [8, 32], strides = [1, 1]} : vector<64x32xf32> to vector<8x32xf32>
    %cst_13 = arith.constant dense<0.000000e+00> : vector<8x32xf32>
    %28 = tpu.matmul %25, %3, %cst_13 {dimension_numbers = #tpu.dot_dimension_numbers<[1], [0], [0], [1], [0, 0, 1, 1], [], []>} : vector<8x32xf32>, vector<32x32xf32>, vector<8x32xf32> -> vector<8x32xf32>
    %29 = arith.addf %27, %28 : vector<8x32xf32>
    %30 = math.tanh %29 : vector<8x32xf32>
    %31 = arith.addf %26, %30 : vector<8x32xf32>
    %32 = vector.extract_strided_slice %2 {offsets = [40, 0], sizes = [8, 32], strides = [1, 1]} : vector<64x32xf32> to vector<8x32xf32>
    %cst_14 = arith.constant dense<0.000000e+00> : vector<8x32xf32>
    %33 = tpu.matmul %30, %3, %cst_14 {dimension_numbers = #tpu.dot_dimension_numbers<[1], [0], [0], [1], [0, 0, 1, 1], [], []>} : vector<8x32xf32>, vector<32x32xf32>, vector<8x32xf32> -> vector<8x32xf32>
    %34 = arith.addf %32, %33 : vector<8x32xf32>
    %35 = math.tanh %34 : vector<8x32xf32>
    %36 = arith.addf %31, %35 : vector<8x32xf32>
    %37 = vector.extract_strided_slice %2 {offsets = [48, 0], sizes = [8, 32], strides = [1, 1]} : vector<64x32xf32> to vector<8x32xf32>
    %cst_15 = arith.constant dense<0.000000e+00> : vector<8x32xf32>
    %38 = tpu.matmul %35, %3, %cst_15 {dimension_numbers = #tpu.dot_dimension_numbers<[1], [0], [0], [1], [0, 0, 1, 1], [], []>} : vector<8x32xf32>, vector<32x32xf32>, vector<8x32xf32> -> vector<8x32xf32>
    %39 = arith.addf %37, %38 : vector<8x32xf32>
    %40 = math.tanh %39 : vector<8x32xf32>
    %41 = arith.addf %36, %40 : vector<8x32xf32>
    %42 = vector.extract_strided_slice %2 {offsets = [56, 0], sizes = [8, 32], strides = [1, 1]} : vector<64x32xf32> to vector<8x32xf32>
    %cst_16 = arith.constant dense<0.000000e+00> : vector<8x32xf32>
    %43 = tpu.matmul %40, %3, %cst_16 {dimension_numbers = #tpu.dot_dimension_numbers<[1], [0], [0], [1], [0, 0, 1, 1], [], []>} : vector<8x32xf32>, vector<32x32xf32>, vector<8x32xf32> -> vector<8x32xf32>
    %44 = arith.addf %42, %43 : vector<8x32xf32>
    %45 = math.tanh %44 : vector<8x32xf32>
    %46 = arith.addf %41, %45 : vector<8x32xf32>
    %cst_17 = arith.constant 1.250000e-01 : f32
    %47 = vector.broadcast %cst_17 : f32 to vector<8x32xf32>
    %48 = arith.mulf %46, %47 : vector<8x32xf32>
    %49 = arith.truncf %48 : vector<8x32xf32> to vector<8x32xbf16>
    %c0_18 = arith.constant 0 : index
    %c0_19 = arith.constant 0 : index
    %50 = vector.load %arg5[%c0_18, %c0_19] : memref<32x128xbf16, #tpu.memory_space<vmem>>, vector<32x128xbf16>
    %cst_20 = arith.constant dense<0.000000e+00> : vector<8x128xf32>
    %51 = tpu.matmul %49, %50, %cst_20 {dimension_numbers = #tpu.dot_dimension_numbers<[1], [0], [0], [1], [0, 0, 1, 1], [], []>} : vector<8x32xbf16>, vector<32x128xbf16>, vector<8x128xf32> -> vector<8x128xf32>
    %c0_21 = arith.constant 0 : index
    %c0_22 = arith.constant 0 : index
    %52 = vector.load %arg6[%c0_21, %c0_22] : memref<1x128xf32, #tpu.memory_space<vmem>>, vector<1x128xf32>
    %53 = vector.broadcast %52 : vector<1x128xf32> to vector<8x128xf32>
    %54 = arith.addf %51, %53 : vector<8x128xf32>
    %c0_23 = arith.constant 0 : index
    %c0_24 = arith.constant 0 : index
    %55 = vector.load %arg7[%c0_23, %c0_24] : memref<8x128xf32, #tpu.memory_space<vmem>>, vector<8x128xf32>
    tpu.vector_store %arg7[%c0_23, %c0_24], %54 {strides = array<i32>} : memref<8x128xf32, #tpu.memory_space<vmem>>, vector<8x128xf32>,
    %c0_25 = arith.constant 0 : index
    %c0_26 = arith.constant 0 : index
    %c0_27 = arith.constant 0 : index
    %56 = vector.load %arg8[%c0_25, %c0_26, %c0_27] : memref<1x8x32xf32, #tpu.memory_space<vmem>>, vector<1x8x32xf32>
    %57 = vector.shape_cast %56 : vector<1x8x32xf32> to vector<8x32xf32>
    %58 = vector.shape_cast %45 : vector<8x32xf32> to vector<1x8x32xf32>
    tpu.vector_store %arg8[%c0_25, %c0_26, %c0_27], %58 {strides = array<i32>} : memref<1x8x32xf32, #tpu.memory_space<vmem>>, vector<1x8x32xf32>,
    return
  }
  func.func @transform_0(%arg0: i32) -> (i32, i32) {
    %c0_i32 = arith.constant 0 : i32
    %c0_i32_0 = arith.constant 0 : i32
    %c0_i32_1 = arith.constant 0 : i32
    return %c0_i32, %c0_i32_0 : i32, i32
  }
  func.func @transform_1(%arg0: i32) -> (i32, i32, i32) {
    %c0_i32 = arith.constant 0 : i32
    %c0_i32_0 = arith.constant 0 : i32
    %c0_i32_1 = arith.constant 0 : i32
    %c0_i32_2 = arith.constant 0 : i32
    return %c0_i32, %c0_i32_0, %c0_i32_1 : i32, i32, i32
  }
  func.func @transform_2(%arg0: i32) -> (i32, i32) {
    %c0_i32 = arith.constant 0 : i32
    %c0_i32_0 = arith.constant 0 : i32
    %c0_i32_1 = arith.constant 0 : i32
    return %c0_i32, %c0_i32_0 : i32, i32
  }
  func.func @transform_3(%arg0: i32) -> (i32, i32) {
    %c0_i32 = arith.constant 0 : i32
    %c0_i32_0 = arith.constant 0 : i32
    %c0_i32_1 = arith.constant 0 : i32
    return %c0_i32, %c0_i32_0 : i32, i32
  }
  func.func @transform_4(%arg0: i32) -> (i32, i32) {
    %c0_i32 = arith.constant 0 : i32
    %c0_i32_0 = arith.constant 0 : i32
    %c0_i32_1 = arith.constant 0 : i32
    return %c0_i32, %c0_i32_0 : i32, i32
  }
  func.func @transform_5(%arg0: i32) -> (i32, i32) {
    %c0_i32 = arith.constant 0 : i32
    %c0_i32_0 = arith.constant 0 : i32
    %c0_i32_1 = arith.constant 0 : i32
    return %c0_i32, %c0_i32_0 : i32, i32
  }
  func.func @transform_6(%arg0: i32) -> (i32, i32) {
    %c0_i32 = arith.constant 0 : i32
    %c0_i32_0 = arith.constant 0 : i32
    %c0_i32_1 = arith.constant 0 : i32
    return %c0_i32, %c0_i32_0 : i32, i32
  }
  func.func @transform_7(%arg0: i32) -> (i32, i32, i32) {
    %c0_i32 = arith.constant 0 : i32
    %c0_i32_0 = arith.constant 0 : i32
    %c0_i32_1 = arith.constant 0 : i32
    %c0_i32_2 = arith.constant 0 : i32
    return %c0_i32, %c0_i32_0, %c0_i32_1 : i32, i32, i32
  }
}

</mosaic_0001>

<bundles_post_ra>
// kernel: tpu_custom_call.1
= control target key start
LH: loop header
LB: loop body
LE: loop exit
PB: predicated region body
PF: predicated region fallthrough
CT: control target
= control target key end

     0   :  { %13 = vsyncpa [#allocation3], 0  ;;  %s1467_s0 = inlined_call_operand.vmem [shape: bf16[64,17], index: 0, kind: input, shape index: {}]   ;;  %s1468_s1 = inlined_call_operand.hbm [shape: f32[1,8,32], index: 1, kind: input, shape index: {}]   ;;  %s1469_s2 = inlined_call_operand.hbm [shape: bf16[17,32], index: 2, kind: input, shape index: {}]   ;;  %s1470_s3 = inlined_call_operand.vmem [shape: f32[32,32], index: 3, kind: input, shape index: {}]   ;;  %s1471_s4 = inlined_call_operand.vmem [shape: bf16[32,128], index: 4, kind: input, shape index: {}]   ;;  %s1472_s5 = inlined_call_operand.vmem [shape: f32[1,128], index: 5, kind: input, shape index: {}]   ;;  %s1473_s6 = inlined_call_operand.hbm [shape: f32[8,128], index: 6, kind: output, shape index: {0}]   ;;  %s1474_s7 = inlined_call_operand.hbm [shape: f32[1,8,32], index: 7, kind: output, shape index: {1}]  }
   0x1   :  { %14 = vsyncpa [#allocation6], 0 }
   0x2   :  { %15 = vsyncpa [#allocation4], 0 }
   0x3   :  { %16 = vsyncpa [#allocation9], 0  ;;  %s1253_s24 = smov [#allocation2]   ;;  %s1254_s26 = smov [#allocation5]  }
   0x4   :  { %s25_s25 = sshll.u32 %s1253_s24, 4  ;;  %s34_s27 = sshll.u32 %s1254_s26, 4  ;;  %s26_s25 = int_to_ptr.vmem [resolvable:$true] %s25_s25  ;;  %s1303_s27 = int_to_ptr.vmem [resolvable:$true] %s34_s27 }
   0x5   :  { %s1157_s30 = scalar_lea.hbm %s1468_s1, 128 }
   0x6   :  { %p1158_p0 = scmp.ne.s32.totalorder %s1468_s1, %s1157_s30  ;;  %p1161_p1 = scmp.lt.u32.totalorder %s1157_s30, %s1468_s1 }
   0x8   :  { %p1163_p2 = pnand %p1161_p1, %p1158_p0 }
   0xa   :  { %1166 = shalt.err (!%p1163_p2)
}
   0xb   :  { %s1167_s12 = scalar_lea.vmem %s26_s25, 128  ;;  %p1172_p4 = scmp.lt.s32.totalorder %s26_s25, %s26_s25 }
   0xc   :  { %p1168_p3 = scmp.ne.s32.totalorder %s26_s25, %s1167_s12  ;;  %p1173_p5 = scmp.lt.s32.totalorder %s1167_s12, %s1167_s12 }
   0xe   :  { %p1174_p6 = por %p1173_p5, %p1172_p4 }
  0x10   :  { %p1175_p7 = pnand %p1174_p6, %p1168_p3 }
  0x12   :  { %1178 = shalt.err (!%p1175_p7)
}
  0x13   :  { %28 = dma.hbm_to_vmem [thread:$0]  %s1468_s1, 128, %s26_s25, [#allocation3]  }
  0x14   :  { %s1179_s17 = scalar_lea.hbm %s1469_s2, 192 }
  0x15   :  { %p1180_p8 = scmp.ne.s32.totalorder %s1469_s2, %s1179_s17  ;;  %p1183_p9 = scmp.lt.u32.totalorder %s1179_s17, %s1469_s2 }
  0x17   :  { %p1185_p10 = pnand %p1183_p9, %p1180_p8 }
  0x19   :  { %1188 = shalt.err (!%p1185_p10)
}
  0x1a   :  { %s1189_s22 = scalar_lea.vmem %s1303_s27, 192  ;;  %p1194_p12 = scmp.lt.s32.totalorder %s1303_s27, %s1303_s27 }
  0x1b   :  { %p1190_p11 = scmp.ne.s32.totalorder %s1303_s27, %s1189_s22  ;;  %p1195_p13 = scmp.lt.s32.totalorder %s1189_s22, %s1189_s22 }
  0x1d   :  { %p1196_p0 = por %p1195_p13, %p1194_p12 }
  0x1f   :  { %p1197_p1 = pnand %p1196_p0, %p1190_p11 }
  0x21   :  { %1200 = shalt.err (!%p1197_p1)
}
  0x22   :  { %s1255_s1 = smov 64   ;;  %s1256_s23 = smov 4  }
  0x23   :  { %40 = dma.hbm_to_vmem [thread:$0]  %s1469_s2, 192, %s1303_s27, [#allocation6], %s1255_s1, %s1255_s1, %s1256_s23  }
  0x24   :  { %1245 = dma.done.wait [#allocation3], 128  }
  0x25   :  { %1246 = vsyncadd [#allocation3], 4294967168 }
  0x26   :  { %1247 = dma.done.wait [#allocation6], 192  }
  0x27   :  { %1248 = vsyncadd [#allocation6], 4294967104  ;;  %vm107_vm0 = vcmask 1040384   ;;  %vm94_vm1 = vcmask 138240   ;;  %v1133_v0 = vld [vmem:[#allocation5] sm:$0xff]   ;;  %v1257_v1 = vmov 0  }
  0x28   :  { %v109_v2 = vsel %vm107_vm0, 65535, %v1257_v1  ;;  %v1134_v3 = vld [vmem:[#allocation5 + $0x8] ss:$0 sps:$4 sm:$0x11]   ;;  %1119 = vmatprep.subr.bf16.mxu1 %v1133_v0  ;;  %963 = vmatprep.subr.bf16.mxu0 %v1133_v0  ;;  %v178_v6 = vld [vmem:[%s1470_s3] sm:$0xff]  ;;  %v179_v7 = vld [vmem:[%s1470_s3 + $0x8] sm:$0xff] }
  0x29   :  { %v1135_v4 = vld [vmem:[%s1467_s0 + $0x10] sm:$0xff]   ;;  %1121 = vmatpush3.bf16.msra.mxu1 %v1133_v0  ;;  %v111_v5 = vand.u32 %v1134_v3, %v109_v2  ;;  %964 = vmatpush3.bf16.msra.mxu0 %v1133_v0  ;;  %v1137_v8 = vld [vmem:[%s1467_s0] sm:$0xff]   ;;  %v1136_v9 = vld [vmem:[%s1467_s0 + $0x18] sm:$0xff]   ;;  %v1353_v11 = vpack.c.bf16 %v179_v7, %v178_v6  ;;  %v1258_v13 = vmov 0.0|0.0   ;;  %vm1259_vm2 = vmmov 0   ;;  %s1261_s20 = smov [#allocation8]  }
  0x2a   :  { %971 = vmatprep.mubr.msk.bf16.mxu1 %vm94_vm1, %v1135_v4  ;;  %v1138_v10 = vld [vmem:[%s1467_s0 + $0x8] sm:$0xff]   ;;  %v180_v12 = vld [vmem:[%s1470_s3 + $0x10] sm:$0xff]  ;;  %967 = vmatprep.mubr.msk.bf16.mxu0 %vm94_vm1, %v1137_v8  ;;  %v181_v14 = vld [vmem:[%s1470_s3 + $0x18] sm:$0xff]  ;;  %v1260_v16 = vmov 0.0   ;;  %vm183_vm3 = vcmask 261120   ;;  %s878_s21 = sshll.u32 %s1261_s20, 4  ;;  %s879_s21 = int_to_ptr.vmem [resolvable:$true] %s878_s21 }
  0x2b   :  { %1120 = vmatprep.subr.bf16.mxu1 %v111_v5  ;;  %965 = vmatprep.subr.bf16.mxu0 %v111_v5  ;;  %v1367_v15 = vpack.c.bf16 %v181_v14, %v180_v12  ;;  %v182_v17 = vld [vmem:[#allocation2] sm:$0xff]  ;;  %v1140_v61 = vld [vmem:[%s1471_s4 + $0x8] sm:$0xff]   ;;  %s1201_s22 = scalar_lea.vmem %s879_s21, 128  ;;  %p1206_p3 = scmp.lt.s32.totalorder %s879_s21, %s879_s21 }
  0x2c   :  { %v1139_v60 = vld [vmem:[%s1471_s4] sm:$0xff]   ;;  %p1202_p2 = scmp.ne.s32.totalorder %s879_s21, %s1201_s22  ;;  %p1207_p4 = scmp.lt.s32.totalorder %s1201_s22, %s1201_s22 }
  0x2d   :  { %1122 = vmatpush3.bf16.msra.mxu1 %v111_v5  ;;  %966 = vmatpush3.bf16.msra.mxu0 %v111_v5 }
  0x2e   :  { %1071 = vmatprep.subr.bf16.mxu1 %v1258_v13  ;;  %1083 = vmatprep.subr.bf16.mxu0 %v1258_v13  ;;  %p1208_p5 = por %p1207_p4, %p1206_p3 }
  0x30   :  { %972 = vmatmul.mubr.msk.bf16.vlgmr.msra.gmra.mrb[0].mxu1 %vm94_vm1, %v1136_v9  ;;  %968 = vmatmul.mubr.msk.bf16.vlgmr.msra.gmra.mrb[0].mxu0 %vm94_vm1, %v1138_v10  ;;  %p1209_p6 = pnand %p1208_p5, %p1202_p2 }
  0x31   :  { %1073 = vmatpush3.bf16.msra.mxu1 %v1353_v11  ;;  %983 = vmatprep.mubr.msk.f32.mxu1 %vm1259_vm2, %v1260_v16 }
  0x32   :  { %1074 = vmatprep.subr.bf16.mxu1 %v1258_v13  ;;  %1085 = vmatpush3.bf16.msra.mxu0 %v1353_v11 }
  0x33   :  { %1086 = vmatprep.subr.bf16.mxu0 %v1258_v13  ;;  %1005 = vmatprep.mubr.msk.f32.mxu0 %vm1259_vm2, %v1260_v16 }
  0x35   :  { %1076 = vmatpush3.bf16.msra.mxu1 %v1367_v15 }
  0x36   :  { %1077 = vmatprep.subr.bf16.mxu1 %v1258_v13  ;;  %1088 = vmatpush3.bf16.msra.mxu0 %v1367_v15 }
  0x37   :  { %1095 = vmatprep.subr.bf16.mxu0 %v1258_v13 }
  0x38   :  { %984 = vmatmul.mubr.msk.f32.vlgmr.msra.gmra.mrb[4].mxu1 %vm183_vm3, %v182_v17 }
  0x39   :  { %1079 = vmatpush3.bf16.msra.mxu1 %v1353_v11  ;;  %994 = vmatprep.mubr.msk.f32.mxu1 %vm1259_vm2, %v1260_v16 }
  0x3a   :  { %1080 = vmatprep.subr.bf16.mxu1 %v1258_v13 }
  0x3d   :  { %1082 = vmatpush3.bf16.msra.mxu1 %v1367_v15 }
  0x3e   :  { %1089 = vmatprep.subr.bf16.mxu1 %v1258_v13 }
 0x103   :  { %v1387_v18 = vpop.f32.mrb[0].mxu1  ;;  %v969_v19 = vpop.f32.mrb[0].mxu0 }
 0x104   :  { %v163_v20 = vpop.f32.mrb[1].mxu1  ;;  %v147_v21 = vpop.f32.mrb[1].mxu0 }
 0x105   :  { %v1389_v22 = vpop.f32.mrb[2].mxu1  ;;  %v970_v23 = vpop.f32.mrb[2].mxu0 }
 0x106   :  { %v166_v24 = vpop.f32.mrb[3].mxu1  ;;  %v150_v25 = vpop.f32.mrb[3].mxu0 }
 0x10b   :  { %v253_v26 = vpop.f32.mrb[4].mxu1 }
 0x10c   :  { %v257_v27 = vadd.f32 %v253_v26, %v147_v21  ;;  %v985_v28 = vpop.f32.mrb[5].mxu1 }
 0x10e   :  { %1141 = vtanh.f32 %v257_v27 }
 0x118   :  { %v1142_v29 = vpop.eup %1141 }
 0x119   :  { %995 = vmatmul.mubr.msk.f32.vlgmr.msra.gmra.mrb[6].mxu1 %vm183_vm3, %v1142_v29 }
 0x11a   :  { %1091 = vmatpush3.bf16.msra.mxu1 %v1353_v11  ;;  %1016 = vmatprep.mubr.msk.f32.mxu1 %vm1259_vm2, %v1260_v16 }
 0x11b   :  { %1092 = vmatprep.subr.bf16.mxu1 %v1258_v13 }
 0x11e   :  { %1094 = vmatpush3.bf16.msra.mxu1 %v1367_v15 }
 0x11f   :  { %1101 = vmatprep.subr.bf16.mxu1 %v1258_v13 }
 0x1ec   :  { %v329_v30 = vpop.f32.mrb[6].mxu1 }
 0x1ed   :  { %v333_v31 = vadd.f32 %v329_v30, %v150_v25  ;;  %v996_v32 = vpop.f32.mrb[7].mxu1 }
 0x1ef   :  { %1143 = vtanh.f32 %v333_v31 }
 0x1f9   :  { %v1144_v33 = vpop.eup %1143 }
 0x1fa   :  { %1006 = vmatmul.mubr.msk.f32.vlgmr.msra.gmra.mrb[4].mxu0 %vm183_vm3, %v1144_v33  ;;  %v335_v37 = vadd.f32 %v1144_v33, %v1142_v29 }
 0x1fb   :  { %1097 = vmatpush3.bf16.msra.mxu0 %v1353_v11  ;;  %1027 = vmatprep.mubr.msk.f32.mxu0 %vm1259_vm2, %v1260_v16 }
 0x1fc   :  { %1098 = vmatprep.subr.bf16.mxu0 %v1258_v13 }
 0x1ff   :  { %1100 = vmatpush3.bf16.msra.mxu0 %v1367_v15 }
 0x200   :  { %1107 = vmatprep.subr.bf16.mxu0 %v1258_v13 }
 0x2cd   :  { %v405_v34 = vpop.f32.mrb[4].mxu0 }
 0x2ce   :  { %v409_v35 = vadd.f32 %v969_v19, %v405_v34  ;;  %v1007_v36 = vpop.f32.mrb[5].mxu0 }
 0x2d0   :  { %1145 = vtanh.f32 %v409_v35 }
 0x2da   :  { %v1146_v38 = vpop.eup %1145 }
 0x2db   :  { %v411_v39 = vadd.f32 %v1146_v38, %v335_v37  ;;  %1017 = vmatmul.mubr.msk.f32.vlgmr.msra.gmra.mrb[8].mxu1 %vm183_vm3, %v1146_v38 }
 0x2dc   :  { %1103 = vmatpush3.bf16.msra.mxu1 %v1353_v11  ;;  %1038 = vmatprep.mubr.msk.f32.mxu1 %vm1259_vm2, %v1260_v16 }
 0x2dd   :  { %1104 = vmatprep.subr.bf16.mxu1 %v1258_v13 }
 0x2e0   :  { %1106 = vmatpush3.bf16.msra.mxu1 %v1367_v15 }
 0x2e1   :  { %1113 = vmatprep.subr.bf16.mxu1 %v1258_v13 }
 0x3ae   :  { %v481_v40 = vpop.f32.mrb[8].mxu1 }
 0x3af   :  { %v485_v41 = vadd.f32 %v970_v23, %v481_v40  ;;  %v1018_v42 = vpop.f32.mrb[9].mxu1 }
 0x3b1   :  { %1147 = vtanh.f32 %v485_v41 }
 0x3bb   :  { %v1148_v43 = vpop.eup %1147 }
 0x3bc   :  { %v487_v44 = vadd.f32 %v1148_v43, %v411_v39  ;;  %1028 = vmatmul.mubr.msk.f32.vlgmr.msra.gmra.mrb[6].mxu0 %vm183_vm3, %v1148_v43 }
 0x3bd   :  { %1109 = vmatpush3.bf16.msra.mxu0 %v1353_v11  ;;  %1049 = vmatprep.mubr.msk.f32.mxu0 %vm1259_vm2, %v1260_v16 }
 0x3be   :  { %1110 = vmatprep.subr.bf16.mxu0 %v1258_v13 }
 0x3c1   :  { %1112 = vmatpush3.bf16.msra.mxu0 %v1367_v15 }
 0x3c2   :  { %1063 = vmatprep.subr.bf16.mxu0 %v1260_v16 }
 0x48f   :  { %v557_v45 = vpop.f32.mrb[6].mxu0 }
 0x490   :  { %v561_v46 = vadd.f32 %v557_v45, %v163_v20  ;;  %v1029_v47 = vpop.f32.mrb[7].mxu0 }
 0x492   :  { %1149 = vtanh.f32 %v561_v46 }
 0x49c   :  { %v1150_v48 = vpop.eup %1149 }
 0x49d   :  { %v563_v49 = vadd.f32 %v1150_v48, %v487_v44  ;;  %1039 = vmatmul.mubr.msk.f32.vlgmr.msra.gmra.mrb[10].mxu1 %vm183_vm3, %v1150_v48 }
 0x49e   :  { %1115 = vmatpush3.bf16.msra.mxu1 %v1353_v11  ;;  %1060 = vmatprep.mubr.msk.f32.mxu1 %vm1259_vm2, %v1260_v16 }
 0x49f   :  { %1116 = vmatprep.subr.bf16.mxu1 %v1258_v13 }
 0x4a2   :  { %1118 = vmatpush3.bf16.msra.mxu1 %v1367_v15 }
 0x570   :  { %v633_v50 = vpop.f32.mrb[10].mxu1 }
 0x571   :  { %v637_v51 = vadd.f32 %v633_v50, %v166_v24  ;;  %v1040_v52 = vpop.f32.mrb[11].mxu1 }
 0x573   :  { %1151 = vtanh.f32 %v637_v51 }
 0x57d   :  { %v1152_v53 = vpop.eup %1151 }
 0x57e   :  { %v639_v54 = vadd.f32 %v1152_v53, %v563_v49  ;;  %1050 = vmatmul.mubr.msk.f32.vlgmr.msra.gmra.mrb[8].mxu0 %vm183_vm3, %v1152_v53 }
 0x57f   :  { %1067 = vmatprep.mubr.msk.bf16.mxu0 %vm1259_vm2, %v1260_v16  ;;  %1064 = vmatpush3.bf16.msra.mxu0 %v1139_v60 }
 0x580   :  { %1065 = vmatprep.subr.bf16.mxu0 %v1260_v16 }
 0x583   :  { %1066 = vmatpush3.bf16.msra.mxu0 %v1140_v61 }
 0x651   :  { %v709_v55 = vpop.f32.mrb[8].mxu0 }
 0x652   :  { %v713_v56 = vadd.f32 %v1387_v18, %v709_v55  ;;  %v1051_v57 = vpop.f32.mrb[9].mxu0 }
 0x654   :  { %1153 = vtanh.f32 %v713_v56 }
 0x65e   :  { %v1154_v58 = vpop.eup %1153 }
 0x65f   :  { %v715_v59 = vadd.f32 %v1154_v58, %v639_v54  ;;  %1061 = vmatmul.mubr.msk.f32.vlgmr.msra.gmra.mrb[12].mxu1 %vm183_vm3, %v1154_v58 }
 0x732   :  { %v785_v62 = vpop.f32.mrb[12].mxu1 }
 0x733   :  { %v789_v63 = vadd.f32 %v1389_v22, %v785_v62  ;;  %v1062_v0 = vpop.f32.mrb[13].mxu1 }
 0x735   :  { %1155 = vtanh.f32 %v789_v63 }
 0x73f   :  { %v1156_v1 = vpop.eup %1155 }
 0x740   :  { %v791_v2 = vadd.f32 %v1156_v1, %v715_v59  ;;  %861 = vst.msk [vmem:[#allocation8] sm:$0xff] %vm183_vm3, %v1156_v1 }
 0x742   :  { %v792_v3 = vmul.f32 0.125, %v791_v2 }
 0x744   :  { %v793_v4 = vpack.c.bf16 %v792_v3, %v792_v3 }
 0x746   :  { %1068 = vmatmul.mubr.msk.bf16.vlgmr.msra.gmra.mrb[12].mxu0 %vm183_vm3, %v793_v4 }
 0x747   :  { %1212 = shalt.err (!%p1209_p6)
}
 0x748   :  { %s1213_s23 = scalar_lea.hbm %s1474_s7, 128 }
 0x749   :  { %p1214_p7 = scmp.ne.s32.totalorder %s1474_s7, %s1213_s23  ;;  %p1217_p8 = scmp.lt.u32.totalorder %s1213_s23, %s1474_s7 }
 0x74b   :  { %p1219_p9 = pnand %p1217_p8, %p1214_p7 }
 0x74d   :  { %1222 = shalt.err (!%p1219_p9)
}
 0x74e   :  { %881 = dma.vmem_to_hbm [thread:$0]  %s879_s21, 128, %s1474_s7, [#allocation9]   ;;  %v910_v5 = vld [vmem:[%s1472_s5] ss:$0 sm:$0xff] }
 0x74f   :  { %s1262_s8 = smov [#allocation7]  }
 0x750   :  { %s868_s9 = sshll.u32 %s1262_s8, 4  ;;  %s869_s9 = int_to_ptr.vmem [resolvable:$true] %s868_s9 }
 0x751   :  { %s1223_s10 = scalar_lea.vmem %s869_s9, 128  ;;  %p1228_p11 = scmp.lt.s32.totalorder %s869_s9, %s869_s9 }
 0x752   :  { %p1224_p10 = scmp.ne.s32.totalorder %s869_s9, %s1223_s10  ;;  %p1229_p12 = scmp.lt.s32.totalorder %s1223_s10, %s1223_s10 }
 0x754   :  { %p1230_p13 = por %p1229_p12, %p1228_p11 }
 0x756   :  { %p1231_p0 = pnand %p1230_p13, %p1224_p10 }
 0x819   :  { %v854_v6 = vpop.f32.mrb[12].mxu0 }
 0x81a   :  { %v855_v7 = vadd.f32 %v910_v5, %v854_v6  ;;  %v1069_v8 = vpop.f32.mrb[13].mxu0 }
 0x81b   :  { %v857_v9 = vpop.f32.mrb[14].mxu0 }
 0x81c   :  { %860 = vst [vmem:[#allocation7] sm:$0xff] %v855_v7  ;;  %v1070_v10 = vpop.f32.mrb[15].mxu0 }
 0x81d   :  { %1234 = shalt.err (!%p1231_p0)
}
 0x81e   :  { %s1235_s5 = scalar_lea.hbm %s1473_s6, 128 }
 0x81f   :  { %p1236_p1 = scmp.ne.s32.totalorder %s1473_s6, %s1235_s5  ;;  %p1239_p2 = scmp.lt.u32.totalorder %s1235_s5, %s1473_s6 }
 0x821   :  { %p1241_p3 = pnand %p1239_p2, %p1236_p1 }
 0x823   :  { %1244 = shalt.err (!%p1241_p3)
}
 0x824   :  { %871 = dma.vmem_to_hbm [thread:$0]  %s869_s9, 128, %s1473_s6, [#allocation4]  }
 0x825   :  { %1249 = dma.done.wait [#allocation4], 128  }
 0x826   :  { %1250 = vsyncadd [#allocation4], 4294967168 }
 0x827   :  { %1251 = dma.done.wait [#allocation9], 128  }
 0x828   :  { %1252 = vsyncadd [#allocation9], 4294967168 }
 0x829   :  { %888 = vsyncpa [#allocation3], 1 }
 0x82a   :  { %889 = vsyncpa [#allocation6], 1 }
 0x82b   :  { %890 = vsyncpa [#allocation4], 1 }
 0x82c   :  { %891 = vsyncpa [#allocation9], 1 }

</bundles_post_ra>
